<compile_context>
chip_gen: v6e
topology: v6e:2x2x1
jax: 0.10.0
libtpu: 0.0.40
codegen_flags: <defaults>
</compile_context>

<pallas_src>
import math
import functools

import jax
import jax.numpy as jnp
import numpy as np
from jax.experimental import pallas as pl
from jax.experimental.pallas import tpu as pltpu


def _round_up(n, m):
    return ((n + m - 1) // m) * m


def _var_lstm_seq_kernel(igates_ref, h0_ref, c0_ref, nh_ref, whh_ref,
                         hy_ref, cy_ref, h_sc, c_sc, *, hidden_padded):
    """One timestep of the variational LSTM recurrence (grid axis 0 = time)."""
    t = pl.program_id(0)

    @pl.when(t == 0)
    def _():
        h_sc[...] = h0_ref[...].astype(jnp.float32)
        c_sc[...] = c0_ref[...].astype(jnp.float32)

    # Recurrent projection: (B, Hp) @ (Hp, 4Hp).  Operands may be bf16; the
    # accumulation is f32.  W_hh is resident in VMEM across all grid steps.
    h_noised = (h_sc[...] * nh_ref[...].astype(jnp.float32)).astype(whh_ref.dtype)
    hgates = jnp.dot(h_noised, whh_ref[...], preferred_element_type=jnp.float32)

    # igates already holds x@W_ih^T + b_ih + b_hh (precomputed in the wrapper).
    gates = igates_ref[0] + hgates

    Hp = hidden_padded
    ingate = jax.nn.sigmoid(gates[:, 0 * Hp:1 * Hp])
    forgetgate = jax.nn.sigmoid(gates[:, 1 * Hp:2 * Hp])
    cellgate = jnp.tanh(gates[:, 2 * Hp:3 * Hp])
    outgate = jax.nn.sigmoid(gates[:, 3 * Hp:4 * Hp])

    c_new = forgetgate * c_sc[...] + ingate * cellgate
    h_new = outgate * jnp.tanh(c_new)

    h_sc[...] = h_new
    c_sc[...] = c_new
    hy_ref[0] = h_new.astype(hy_ref.dtype)
    cy_ref[0] = c_new.astype(cy_ref.dtype)


@functools.partial(jax.jit, static_argnames=("compute_dtype",))
def var_fast_lstm_sequence(x_seq, hx, cx, w_ih, w_hh, b_ih, b_hh,
                           noise_in=None, noise_hidden=None,
                           compute_dtype=jnp.bfloat16):
    """Run VarFastLSTMCell.forward over a whole sequence.

    x_seq:  (T, B, I)       hx, cx: (B, H)
    w_ih:   (4H, I)         w_hh:   (4H, H)
    b_ih, b_hh: (4H,)
    noise_in / noise_hidden: optional (B, I) / (B, H) variational dropout masks
        (already scaled by 1/(1-p)); None means eval mode (no dropout).
    compute_dtype: dtype of the matmul operands (bf16 recommended; accumulation
        and all gate/state math stay f32).
    Returns (hy_all, cy_all), each (T, B, H).
    """
    T, B, I = x_seq.shape
    H = hx.shape[1]
    assert w_ih.shape == (4 * H, I)
    assert w_hh.shape == (4 * H, H)

    if noise_in is None:
        noise_in = jnp.ones((B, I), dtype=x_seq.dtype)
    if noise_hidden is None:
        noise_hidden = jnp.ones((B, H), dtype=hx.dtype)

    cd = compute_dtype
    Bp = _round_up(max(B, 1), 8)
    Ip = _round_up(I, 128)
    Hp = _round_up(H, 128)

    # ---- Pre-transpose + pad weights once (gate-blocked so [i,f,g,o] stay
    #      aligned to Hp boundaries along the 4Hp axis). ----------------------
    w_ih4 = jnp.pad(w_ih.reshape(4, H, I), ((0, 0), (0, Hp - H), (0, Ip - I)))
    w_ih_t = jnp.transpose(w_ih4, (2, 0, 1)).reshape(Ip, 4 * Hp).astype(cd)

    w_hh4 = jnp.pad(w_hh.reshape(4, H, H), ((0, 0), (0, Hp - H), (0, Hp - H)))
    w_hh_t = jnp.transpose(w_hh4, (2, 0, 1)).reshape(Hp, 4 * Hp).astype(cd)

    bias = (b_ih + b_hh).astype(jnp.float32).reshape(4, H)
    bias = jnp.pad(bias, ((0, 0), (0, Hp - H))).reshape(1, 4 * Hp)

    # ---- Hoisted input projection: one big (T*Bp, Ip) @ (Ip, 4Hp) matmul. ---
    x_p = jnp.pad(x_seq, ((0, 0), (0, Bp - B), (0, Ip - I)))
    nin_p = jnp.pad(noise_in.astype(x_seq.dtype), ((0, Bp - B), (0, Ip - I)))
    x_noised = (x_p * nin_p[None]).astype(cd)
    igates = jnp.dot(x_noised.reshape(T * Bp, Ip), w_ih_t,
                     preferred_element_type=jnp.float32)
    igates = igates.reshape(T, Bp, 4 * Hp) + bias          # biases folded in

    # ---- Padded state / hidden-noise (padded lanes stay exactly zero). ------
    h0 = jnp.pad(hx.astype(jnp.float32), ((0, Bp - B), (0, Hp - H)))
    c0 = jnp.pad(cx.astype(jnp.float32), ((0, Bp - B), (0, Hp - H)))
    nh_p = jnp.pad(noise_hidden.astype(jnp.float32),
                   ((0, Bp - B), (0, Hp - H)))

    # ---- VMEM budget: resident W_hh + double-buffered per-step blocks. ------
    itemsize = jnp.dtype(cd).itemsize
    bytes_est = (
        2 * Bp * 4 * Hp * 4            # igates block, double buffered
        + 2 * Hp * 4 * Hp * itemsize   # resident W_hh (+ headroom)
        + 6 * Bp * Hp * 4              # h0 / c0 / noise_hidden
        + 4 * Bp * Hp * 4              # hy / cy blocks, double buffered
        + 2 * Bp * Hp * 4              # h/c scratch
    )
    # Clamp at 64 MiB so the request is also legal on v7x (smaller VMEM).
    vmem_limit = int(min(64 * 1024 * 1024,
                         max(32 * 1024 * 1024, 2 * bytes_est)))

    kernel = functools.partial(_var_lstm_seq_kernel, hidden_padded=Hp)

    hy_p, cy_p = pl.pallas_call(
        kernel,
        out_shape=(
            jax.ShapeDtypeStruct((T, Bp, Hp), hx.dtype),
            jax.ShapeDtypeStruct((T, Bp, Hp), cx.dtype),
        ),
        grid_spec=pltpu.PrefetchScalarGridSpec(
            num_scalar_prefetch=0,
            grid=(T,),
            in_specs=[
                pl.BlockSpec((1, Bp, 4 * Hp), lambda t: (t, 0, 0)),  # igates
                pl.BlockSpec((Bp, Hp), lambda t: (0, 0)),            # h0
                pl.BlockSpec((Bp, Hp), lambda t: (0, 0)),            # c0
                pl.BlockSpec((Bp, Hp), lambda t: (0, 0)),            # noise_h
                pl.BlockSpec((Hp, 4 * Hp), lambda t: (0, 0)),        # W_hh^T
            ],
            out_specs=[
                pl.BlockSpec((1, Bp, Hp), lambda t: (t, 0, 0)),      # hy
                pl.BlockSpec((1, Bp, Hp), lambda t: (t, 0, 0)),      # cy
            ],
            scratch_shapes=[
                pltpu.VMEM((Bp, Hp), jnp.float32),                   # h state
                pltpu.VMEM((Bp, Hp), jnp.float32),                   # c state
            ],
        ),
        compiler_params=pltpu.CompilerParams(
            dimension_semantics=("arbitrary",),   # recurrence is sequential
            vmem_limit_bytes=vmem_limit,
        ),
    )(igates, h0, c0, nh_p, w_hh_t)

    return hy_p[:, :B, :H], cy_p[:, :B, :H]


def var_fast_lstm_cell(x, hx, cx, w_ih, w_hh, b_ih, b_hh,
                       noise_in=None, noise_hidden=None,
                       compute_dtype=jnp.float32):
    """Single-step API matching VarFastLSTMCell.forward. Returns (hy, cy)."""
    hy, cy = var_fast_lstm_sequence(x[None], hx, cx, w_ih, w_hh, b_ih, b_hh,
                                    noise_in, noise_hidden,
                                    compute_dtype=compute_dtype)
    return hy[0], cy[0]


def _reference_sequence(x_seq, hx, cx, w_ih, w_hh, b_ih, b_hh,
                        noise_in, noise_hidden, compute_dtype=jnp.float32):
    """Plain-JAX mirror of the PyTorch forward, unrolled over T.

    With compute_dtype=float32 this is exactly the module math; with bfloat16
    it mirrors the kernel's operand precision (f32 accumulation either way).
    """
    cd = compute_dtype
    H = hx.shape[1]
    w_ih_t = w_ih.T.astype(cd)
    w_hh_t = w_hh.T.astype(cd)
    b = (b_ih + b_hh).astype(jnp.float32)
    h = hx.astype(jnp.float32)
    c = cx.astype(jnp.float32)
    hs, cs = [], []
    for t in range(x_seq.shape[0]):
        xn = (x_seq[t] * noise_in).astype(cd)
        hn = (h * noise_hidden).astype(cd)
        gates = (jnp.dot(xn, w_ih_t, preferred_element_type=jnp.float32)
                 + jnp.dot(hn, w_hh_t, preferred_element_type=jnp.float32) + b)
        i = jax.nn.sigmoid(gates[:, 0 * H:1 * H])
        f = jax.nn.sigmoid(gates[:, 1 * H:2 * H])
        g = jnp.tanh(gates[:, 2 * H:3 * H])
        o = jax.nn.sigmoid(gates[:, 3 * H:4 * H])
        c = f * c + i * g
        h = o * jnp.tanh(c)
        hs.append(h)
        cs.append(c)
    return jnp.stack(hs), jnp.stack(cs)


if __name__ == "__main__":
    # Small, deterministic shapes (deliberately NOT multiples of 8/128 to
    # exercise the padding path).
    seq_len = 6
    batch = 4
    input_size = 48
    hidden_size = 32
    p_in, p_hidden = 0.5, 0.5

    key = jax.random.PRNGKey(0)
    k_wih, k_whh, k_bih, k_bhh, k_x, k_h, k_c, k_nin, k_nh = jax.random.split(key, 9)

    # Weight init mirrors reset_parameters() (U(-stdv, stdv)); biases are given
    # small random values here to exercise the bias-fold path of forward().
    stdv = 1.0 / math.sqrt(hidden_size)
    w_ih = jax.random.uniform(k_wih, (4 * hidden_size, input_size),
                              jnp.float32, minval=-stdv, maxval=stdv)
    w_hh = jax.random.uniform(k_whh, (4 * hidden_size, hidden_size),
                              jnp.float32, minval=-stdv, maxval=stdv)
    b_ih = jax.random.uniform(k_bih, (4 * hidden_size,), jnp.float32,
                              minval=-stdv, maxval=stdv)
    b_hh = jax.random.uniform(k_bhh, (4 * hidden_size,), jnp.float32,
                              minval=-stdv, maxval=stdv)

    x_seq = jax.random.normal(k_x, (seq_len, batch, input_size), jnp.float32)
    hx = jax.random.normal(k_h, (batch, hidden_size), jnp.float32)
    cx = jax.random.normal(k_c, (batch, hidden_size), jnp.float32)

    # reset_noise(batch) in training mode: Bernoulli(1-p)/(1-p) masks, shared
    # across all timesteps (variational dropout).
    noise_in = (jax.random.bernoulli(k_nin, 1.0 - p_in, (batch, input_size))
                .astype(jnp.float32) / (1.0 - p_in))
    noise_hidden = (jax.random.bernoulli(k_nh, 1.0 - p_hidden,
                                         (batch, hidden_size))
                    .astype(jnp.float32) / (1.0 - p_hidden))

    # 1) f32 kernel vs exact f32 reference (module semantics).
    hy32, cy32 = var_fast_lstm_sequence(x_seq, hx, cx, w_ih, w_hh, b_ih, b_hh,
                                        noise_in, noise_hidden,
                                        compute_dtype=jnp.float32)
    jax.block_until_ready((hy32, cy32))
    hy_ref32, cy_ref32 = _reference_sequence(x_seq, hx, cx, w_ih, w_hh,
                                             b_ih, b_hh, noise_in, noise_hidden,
                                             compute_dtype=jnp.float32)
    np.testing.assert_allclose(np.asarray(hy32), np.asarray(hy_ref32),
                               rtol=1e-5, atol=1e-5)
    np.testing.assert_allclose(np.asarray(cy32), np.asarray(cy_ref32),
                               rtol=1e-5, atol=1e-5)

    # 2) bf16-operand kernel (fast path) vs precision-mirrored reference.
    hy16, cy16 = var_fast_lstm_sequence(x_seq, hx, cx, w_ih, w_hh, b_ih, b_hh,
                                        noise_in, noise_hidden,
                                        compute_dtype=jnp.bfloat16)
    jax.block_until_ready((hy16, cy16))
    hy_ref16, cy_ref16 = _reference_sequence(x_seq, hx, cx, w_ih, w_hh,
                                             b_ih, b_hh, noise_in, noise_hidden,
                                             compute_dtype=jnp.bfloat16)
    np.testing.assert_allclose(np.asarray(hy16), np.asarray(hy_ref16),
                               rtol=5e-3, atol=5e-3)
    np.testing.assert_allclose(np.asarray(cy16), np.asarray(cy_ref16),
                               rtol=5e-3, atol=5e-3)

    # 3) Single-step API (the module's forward() signature).
    hy1, cy1 = var_fast_lstm_cell(x_seq[0], hx, cx, w_ih, w_hh, b_ih, b_hh,
                                  noise_in, noise_hidden,
                                  compute_dtype=jnp.float32)
    jax.block_until_ready((hy1, cy1))
    np.testing.assert_allclose(np.asarray(hy1), np.asarray(hy_ref32[0]),
                               rtol=1e-5, atol=1e-5)
    np.testing.assert_allclose(np.asarray(cy1), np.asarray(cy_ref32[0]),
                               rtol=1e-5, atol=1e-5)

    print("KERNEL_OK")
</pallas_src>

<mosaic_0001>
module attributes {stable_mosaic.version = 11 : i64} {
  func.func @_var_lstm_seq_kernel(%arg0: i32, %arg1: memref<1x8x512xf32, #tpu.memory_space<vmem>>, %arg2: memref<8x128xf32, #tpu.memory_space<vmem>>, %arg3: memref<8x128xf32, #tpu.memory_space<vmem>>, %arg4: memref<8x128xf32, #tpu.memory_space<vmem>>, %arg5: memref<128x512xf32, #tpu.memory_space<vmem>>, %arg6: memref<1x8x128xf32, #tpu.memory_space<vmem>>, %arg7: memref<1x8x128xf32, #tpu.memory_space<vmem>>, %arg8: memref<8x128xf32, #tpu.memory_space<vmem>>, %arg9: memref<8x128xf32, #tpu.memory_space<vmem>>) attributes {dimension_semantics = [#tpu.dimension_semantics<arbitrary>], iteration_bounds = array<i64: 6>, scalar_prefetch = 0 : i64, scratch_operands = 2 : i64, tpu.core_type = #tpu.core_type<tc>, window_params = [{transform_indices = @transform_0, window_bounds = array<i64: 1, 8, 512>}, {pipeline_mode = #tpu.pipeline_mode<synchronous>, transform_indices = @transform_1, window_bounds = array<i64: 8, 128>}, {pipeline_mode = #tpu.pipeline_mode<synchronous>, transform_indices = @transform_2, window_bounds = array<i64: 8, 128>}, {pipeline_mode = #tpu.pipeline_mode<synchronous>, transform_indices = @transform_3, window_bounds = array<i64: 8, 128>}, {pipeline_mode = #tpu.pipeline_mode<synchronous>, transform_indices = @transform_4, window_bounds = array<i64: 128, 512>}, {transform_indices = @transform_5, window_bounds = array<i64: 1, 8, 128>}, {transform_indices = @transform_6, window_bounds = array<i64: 1, 8, 128>}]} {
    %c0_i32 = arith.constant 0 : i32
    %0 = arith.cmpi eq, %arg0, %c0_i32 : i32
    %1 = arith.extui %0 : i1 to i32
    %c0_i32_0 = arith.constant 0 : i32
    %2 = arith.cmpi ne, %1, %c0_i32_0 : i32
    scf.if %2 {
      %c0_24 = arith.constant 0 : index
      %c0_25 = arith.constant 0 : index
      %45 = vector.load %arg2[%c0_24, %c0_25] : memref<8x128xf32, #tpu.memory_space<vmem>>, vector<8x128xf32>
      %c0_26 = arith.constant 0 : index
      %c0_27 = arith.constant 0 : index
      %46 = vector.load %arg8[%c0_26, %c0_27] : memref<8x128xf32, #tpu.memory_space<vmem>>, vector<8x128xf32>
      tpu.vector_store %arg8[%c0_26, %c0_27], %45 {strides = array<i32>} : memref<8x128xf32, #tpu.memory_space<vmem>>, vector<8x128xf32>,
      %c0_28 = arith.constant 0 : index
      %c0_29 = arith.constant 0 : index
      %47 = vector.load %arg3[%c0_28, %c0_29] : memref<8x128xf32, #tpu.memory_space<vmem>>, vector<8x128xf32>
      %c0_30 = arith.constant 0 : index
      %c0_31 = arith.constant 0 : index
      %48 = vector.load %arg9[%c0_30, %c0_31] : memref<8x128xf32, #tpu.memory_space<vmem>>, vector<8x128xf32>
      tpu.vector_store %arg9[%c0_30, %c0_31], %47 {strides = array<i32>} : memref<8x128xf32, #tpu.memory_space<vmem>>, vector<8x128xf32>,
    } else {
    }
    %c0 = arith.constant 0 : index
    %c0_1 = arith.constant 0 : index
    %3 = vector.load %arg8[%c0, %c0_1] : memref<8x128xf32, #tpu.memory_space<vmem>>, vector<8x128xf32>
    %c0_2 = arith.constant 0 : index
    %c0_3 = arith.constant 0 : index
    %4 = vector.load %arg4[%c0_2, %c0_3] : memref<8x128xf32, #tpu.memory_space<vmem>>, vector<8x128xf32>
    %5 = arith.mulf %3, %4 : vector<8x128xf32>
    %c0_4 = arith.constant 0 : index
    %c0_5 = arith.constant 0 : index
    %6 = vector.load %arg5[%c0_4, %c0_5] : memref<128x512xf32, #tpu.memory_space<vmem>>, vector<128x512xf32>
    %cst = arith.constant dense<0.000000e+00> : vector<8x512xf32>
    %7 = tpu.matmul %5, %6, %cst {dimension_numbers = #tpu.dot_dimension_numbers<[1], [0], [0], [1], [0, 0, 1, 1], [], []>} : vector<8x128xf32>, vector<128x512xf32>, vector<8x512xf32> -> vector<8x512xf32>
    %c0_6 = arith.constant 0 : index
    %c0_7 = arith.constant 0 : index
    %c0_8 = arith.constant 0 : index
    %8 = vector.load %arg1[%c0_6, %c0_7, %c0_8] : memref<1x8x512xf32, #tpu.memory_space<vmem>>, vector<1x8x512xf32>
    %9 = vector.shape_cast %8 : vector<1x8x512xf32> to vector<8x512xf32>
    %10 = arith.addf %9, %7 : vector<8x512xf32>
    %11 = vector.extract_strided_slice %10 {offsets = [0, 0], sizes = [8, 128], strides = [1, 1]} : vector<8x512xf32> to vector<8x128xf32>
    %12 = arith.negf %11 : vector<8x128xf32>
    %13 = math.exp %12 : vector<8x128xf32>
    %cst_9 = arith.constant 1.000000e+00 : f32
    %14 = vector.broadcast %cst_9 : f32 to vector<8x128xf32>
    %15 = arith.addf %14, %13 : vector<8x128xf32>
    %16 = arith.divf %14, %15 : vector<8x128xf32>
    %17 = vector.extract_strided_slice %10 {offsets = [0, 128], sizes = [8, 128], strides = [1, 1]} : vector<8x512xf32> to vector<8x128xf32>
    %18 = arith.negf %17 : vector<8x128xf32>
    %19 = math.exp %18 : vector<8x128xf32>
    %cst_10 = arith.constant 1.000000e+00 : f32
    %20 = vector.broadcast %cst_10 : f32 to vector<8x128xf32>
    %21 = arith.addf %20, %19 : vector<8x128xf32>
    %22 = arith.divf %20, %21 : vector<8x128xf32>
    %23 = vector.extract_strided_slice %10 {offsets = [0, 256], sizes = [8, 128], strides = [1, 1]} : vector<8x512xf32> to vector<8x128xf32>
    %24 = math.tanh %23 : vector<8x128xf32>
    %25 = vector.extract_strided_slice %10 {offsets = [0, 384], sizes = [8, 128], strides = [1, 1]} : vector<8x512xf32> to vector<8x128xf32>
    %26 = arith.negf %25 : vector<8x128xf32>
    %27 = math.exp %26 : vector<8x128xf32>
    %cst_11 = arith.constant 1.000000e+00 : f32
    %28 = vector.broadcast %cst_11 : f32 to vector<8x128xf32>
    %29 = arith.addf %28, %27 : vector<8x128xf32>
    %30 = arith.divf %28, %29 : vector<8x128xf32>
    %c0_12 = arith.constant 0 : index
    %c0_13 = arith.constant 0 : index
    %31 = vector.load %arg9[%c0_12, %c0_13] : memref<8x128xf32, #tpu.memory_space<vmem>>, vector<8x128xf32>
    %32 = arith.mulf %22, %31 : vector<8x128xf32>
    %33 = arith.mulf %16, %24 : vector<8x128xf32>
    %34 = arith.addf %32, %33 : vector<8x128xf32>
    %35 = math.tanh %34 : vector<8x128xf32>
    %36 = arith.mulf %30, %35 : vector<8x128xf32>
    %c0_14 = arith.constant 0 : index
    %c0_15 = arith.constant 0 : index
    %37 = vector.load %arg8[%c0_14, %c0_15] : memref<8x128xf32, #tpu.memory_space<vmem>>, vector<8x128xf32>
    tpu.vector_store %arg8[%c0_14, %c0_15], %36 {strides = array<i32>} : memref<8x128xf32, #tpu.memory_space<vmem>>, vector<8x128xf32>,
    %c0_16 = arith.constant 0 : index
    %c0_17 = arith.constant 0 : index
    %38 = vector.load %arg9[%c0_16, %c0_17] : memref<8x128xf32, #tpu.memory_space<vmem>>, vector<8x128xf32>
    tpu.vector_store %arg9[%c0_16, %c0_17], %34 {strides = array<i32>} : memref<8x128xf32, #tpu.memory_space<vmem>>, vector<8x128xf32>,
    %c0_18 = arith.constant 0 : index
    %c0_19 = arith.constant 0 : index
    %c0_20 = arith.constant 0 : index
    %39 = vector.load %arg6[%c0_18, %c0_19, %c0_20] : memref<1x8x128xf32, #tpu.memory_space<vmem>>, vector<1x8x128xf32>
    %40 = vector.shape_cast %39 : vector<1x8x128xf32> to vector<8x128xf32>
    %41 = vector.shape_cast %36 : vector<8x128xf32> to vector<1x8x128xf32>
    tpu.vector_store %arg6[%c0_18, %c0_19, %c0_20], %41 {strides = array<i32>} : memref<1x8x128xf32, #tpu.memory_space<vmem>>, vector<1x8x128xf32>,
    %c0_21 = arith.constant 0 : index
    %c0_22 = arith.constant 0 : index
    %c0_23 = arith.constant 0 : index
    %42 = vector.load %arg7[%c0_21, %c0_22, %c0_23] : memref<1x8x128xf32, #tpu.memory_space<vmem>>, vector<1x8x128xf32>
    %43 = vector.shape_cast %42 : vector<1x8x128xf32> to vector<8x128xf32>
    %44 = vector.shape_cast %34 : vector<8x128xf32> to vector<1x8x128xf32>
    tpu.vector_store %arg7[%c0_21, %c0_22, %c0_23], %44 {strides = array<i32>} : memref<1x8x128xf32, #tpu.memory_space<vmem>>, vector<1x8x128xf32>,
    return
  }
  func.func @transform_0(%arg0: i32) -> (i32, i32, i32) {
    %c0_i32 = arith.constant 0 : i32
    %c0_i32_0 = arith.constant 0 : i32
    %c0_i32_1 = arith.constant 0 : i32
    return %arg0, %c0_i32, %c0_i32_0 : i32, i32, i32
  }
  func.func @transform_1(%arg0: i32) -> (i32, i32) {
    %c0_i32 = arith.constant 0 : i32
    %c0_i32_0 = arith.constant 0 : i32
    %c0_i32_1 = arith.constant 0 : i32
    return %c0_i32, %c0_i32_0 : i32, i32
  }
  func.func @transform_2(%arg0: i32) -> (i32, i32) {
    %c0_i32 = arith.constant 0 : i32
    %c0_i32_0 = arith.constant 0 : i32
    %c0_i32_1 = arith.constant 0 : i32
    return %c0_i32, %c0_i32_0 : i32, i32
  }
  func.func @transform_3(%arg0: i32) -> (i32, i32) {
    %c0_i32 = arith.constant 0 : i32
    %c0_i32_0 = arith.constant 0 : i32
    %c0_i32_1 = arith.constant 0 : i32
    return %c0_i32, %c0_i32_0 : i32, i32
  }
  func.func @transform_4(%arg0: i32) -> (i32, i32) {
    %c0_i32 = arith.constant 0 : i32
    %c0_i32_0 = arith.constant 0 : i32
    %c0_i32_1 = arith.constant 0 : i32
    return %c0_i32, %c0_i32_0 : i32, i32
  }
  func.func @transform_5(%arg0: i32) -> (i32, i32, i32) {
    %c0_i32 = arith.constant 0 : i32
    %c0_i32_0 = arith.constant 0 : i32
    %c0_i32_1 = arith.constant 0 : i32
    return %arg0, %c0_i32, %c0_i32_0 : i32, i32, i32
  }
  func.func @transform_6(%arg0: i32) -> (i32, i32, i32) {
    %c0_i32 = arith.constant 0 : i32
    %c0_i32_0 = arith.constant 0 : i32
    %c0_i32_1 = arith.constant 0 : i32
    return %arg0, %c0_i32, %c0_i32_0 : i32, i32, i32
  }
}

</mosaic_0001>

<bundles_post_ra>
// kernel: var_fast_lstm_sequence.1
= control target key start
LH: loop header
LB: loop body
LE: loop exit
PB: predicated region body
PF: predicated region fallthrough
CT: control target
= control target key end

     0   :  { %s684_s21 = smov 0   ;;  %s917_s0 = inlined_call_operand.vmem [shape: f32[6,8,512], index: 0, kind: input, shape index: {}]   ;;  %s918_s1 = inlined_call_operand.vmem [shape: f32[8,128], index: 1, kind: input, shape index: {}]   ;;  %s919_s2 = inlined_call_operand.vmem [shape: f32[8,128], index: 2, kind: input, shape index: {}]   ;;  %s920_s3 = inlined_call_operand.vmem [shape: f32[8,128], index: 3, kind: input, shape index: {}]   ;;  %s921_s4 = inlined_call_operand.vmem [shape: f32[128,512], index: 4, kind: input, shape index: {}]   ;;  %s922_s5 = inlined_call_operand.vmem [shape: f32[6,8,128], index: 5, kind: output, shape index: {0}]   ;;  %s923_s6 = inlined_call_operand.vmem [shape: f32[6,8,128], index: 6, kind: output, shape index: {1}]  }
   0x1 LB: > { %s599_s22 = sadd.s32 4294967295, %s646_s21   ;;  %p603_p0 = scmp.ge.s32.totalorder %s646_s21, 1  ;;  %s646_s21 = sphi %s684_s21, %s17_s21  }
   0x2   : > { %p215_p1 = scmp.lt.s32.totalorder %s646_s21, 7 }
   0x4   : > { %p216_p2 = pnand %p603_p0, %p215_p1 }
   0x5   : > { %p248_p3 = scmp.lt.s32.totalorder (!%p216_p2), %s599_s22, 5  ;;  %p608_p4 = scmp.ne.s32.totalorder (!%p216_p2), %s599_s22, 0 }
   0x6   : > { %219 = sbr.rel (%p216_p2) target bundleno = 303 (0x12f), region = 40 }
   0xb   : > { %s249_s23 = scalar_select %p248_p3, %s599_s22, 5 }
   0xc   : > { %264 = sbr.rel (%p608_p4) target bundleno = 20 (0x14), region = 44 }
   0xd   : > { %s614_s24 = sshll.u32 %s249_s23, 5  ;;  %s606_s25 = sshll.u32 %s249_s23, 3 }
   0xe   : > { %s695_s28 = scalar_lea.vmem %s917_s0, %s614_s24  ;;  %s700_s7 = scalar_lea.vmem %s922_s5, %s606_s25 }
   0xf   : > { %s705_s10 = scalar_lea.vmem %s923_s6, %s606_s25 }
  0x11   : > { %v265_v0 = vld [vmem:[%s918_s1] sm:$0xff] }
  0x12   : > { %v267_v1 = vld [vmem:[%s919_s2] sm:$0xff]  ;;  %266 = vst [vmem:[#allocation2] sm:$0xff] %v265_v0 }
  0x13   : > { %268 = vst [vmem:[#allocation3] sm:$0xff] %v267_v1 }
  0x14 PF: > { %v333_v2 = vld [vmem:[%s921_s4 + $0x1e8] sm:$0xff]  ;;  %v332_v3 = vld [vmem:[%s921_s4 + $0x1e0] sm:$0xff]  ;;  %v648_v6 = vmov 0.0   ;;  %v335_v11 = vld [vmem:[%s921_s4 + $0x1f8] sm:$0xff] }
  0x15   : > { %v329_v4 = vld [vmem:[%s921_s4 + $0x1c8] sm:$0xff]  ;;  %336 = vmatprep.subr.mxu0 %v333_v2  ;;  %v328_v5 = vld [vmem:[%s921_s4 + $0x1c0] sm:$0xff]  ;;  %400 = vmatprep.mubr.f32.mxu0 %v648_v6  ;;  %v334_v13 = vld [vmem:[%s921_s4 + $0x1f0] sm:$0xff] }
  0x16   : > { %337 = vmatpush1.msra.mxu0 %v332_v3  ;;  %v325_v7 = vld [vmem:[%s921_s4 + $0x1a8] sm:$0xff]  ;;  %471 = vmatprep.mubr.f32.mxu1 %v648_v6  ;;  %v324_v8 = vld [vmem:[%s921_s4 + $0x1a0] sm:$0xff]  ;;  %v331_v15 = vld [vmem:[%s921_s4 + $0x1d8] sm:$0xff] }
  0x17   : > { %338 = vmatprep.subr.mxu0 %v329_v4  ;;  %v321_v9 = vld [vmem:[%s921_s4 + $0x188] sm:$0xff]  ;;  %v320_v10 = vld [vmem:[%s921_s4 + $0x180] sm:$0xff]  ;;  %407 = vmatprep.subr.mxu1 %v335_v11  ;;  %v330_v16 = vld [vmem:[%s921_s4 + $0x1d0] sm:$0xff] }
  0x18   : > { %339 = vmatpush1.msra.mxu0 %v328_v5  ;;  %v317_v12 = vld [vmem:[%s921_s4 + $0x168] sm:$0xff]  ;;  %v316_v14 = vld [vmem:[%s921_s4 + $0x160] sm:$0xff]  ;;  %408 = vmatpush1.msra.mxu1 %v334_v13  ;;  %v327_v18 = vld [vmem:[%s921_s4 + $0x1b8] sm:$0xff] }
  0x19   : > { %340 = vmatprep.subr.mxu0 %v325_v7  ;;  %v313_v17 = vld [vmem:[%s921_s4 + $0x148] sm:$0xff]  ;;  %409 = vmatprep.subr.mxu1 %v331_v15  ;;  %v312_v19 = vld [vmem:[%s921_s4 + $0x140] sm:$0xff]  ;;  %v326_v20 = vld [vmem:[%s921_s4 + $0x1b0] sm:$0xff] }
  0x1a   : > { %341 = vmatpush1.msra.mxu0 %v324_v8  ;;  %410 = vmatpush1.msra.mxu1 %v330_v16  ;;  %v323_v21 = vld [vmem:[%s921_s4 + $0x198] sm:$0xff]  ;;  %v309_v22 = vld [vmem:[%s921_s4 + $0x128] sm:$0xff]  ;;  %v322_v23 = vld [vmem:[%s921_s4 + $0x190] sm:$0xff] }
  0x1b   : > { %342 = vmatprep.subr.mxu0 %v321_v9  ;;  %411 = vmatprep.subr.mxu1 %v327_v18  ;;  %v308_v24 = vld [vmem:[%s921_s4 + $0x120] sm:$0xff]  ;;  %v319_v25 = vld [vmem:[%s921_s4 + $0x178] sm:$0xff]  ;;  %v305_v26 = vld [vmem:[%s921_s4 + $0x108] sm:$0xff] }
  0x1c   : > { %343 = vmatpush1.msra.mxu0 %v320_v10  ;;  %412 = vmatpush1.msra.mxu1 %v326_v20  ;;  %v318_v27 = vld [vmem:[%s921_s4 + $0x170] sm:$0xff]  ;;  %v304_v28 = vld [vmem:[%s921_s4 + $0x100] sm:$0xff]  ;;  %v315_v29 = vld [vmem:[%s921_s4 + $0x158] sm:$0xff] }
  0x1d   : > { %344 = vmatprep.subr.mxu0 %v317_v12  ;;  %413 = vmatprep.subr.mxu1 %v323_v21  ;;  %v301_v30 = vld [vmem:[%s921_s4 + $0xe8] sm:$0xff]  ;;  %v314_v31 = vld [vmem:[%s921_s4 + $0x150] sm:$0xff]  ;;  %v300_v32 = vld [vmem:[%s921_s4 + $0xe0] sm:$0xff] }
  0x1e   : > { %345 = vmatpush1.msra.mxu0 %v316_v14  ;;  %414 = vmatpush1.msra.mxu1 %v322_v23  ;;  %v311_v33 = vld [vmem:[%s921_s4 + $0x138] sm:$0xff]  ;;  %v297_v34 = vld [vmem:[%s921_s4 + $0xc8] sm:$0xff]  ;;  %v310_v35 = vld [vmem:[%s921_s4 + $0x130] sm:$0xff] }
  0x1f   : > { %346 = vmatprep.subr.mxu0 %v313_v17  ;;  %415 = vmatprep.subr.mxu1 %v319_v25  ;;  %v296_v36 = vld [vmem:[%s921_s4 + $0xc0] sm:$0xff]  ;;  %v307_v37 = vld [vmem:[%s921_s4 + $0x118] sm:$0xff]  ;;  %v293_v38 = vld [vmem:[%s921_s4 + $0xa8] sm:$0xff] }
  0x20   : > { %347 = vmatpush1.msra.mxu0 %v312_v19  ;;  %416 = vmatpush1.msra.mxu1 %v318_v27  ;;  %v306_v39 = vld [vmem:[%s921_s4 + $0x110] sm:$0xff]  ;;  %v292_v40 = vld [vmem:[%s921_s4 + $0xa0] sm:$0xff]  ;;  %v303_v41 = vld [vmem:[%s921_s4 + $0xf8] sm:$0xff] }
  0x21   : > { %348 = vmatprep.subr.mxu0 %v309_v22  ;;  %417 = vmatprep.subr.mxu1 %v315_v29  ;;  %v289_v42 = vld [vmem:[%s921_s4 + $0x88] sm:$0xff]  ;;  %v302_v43 = vld [vmem:[%s921_s4 + $0xf0] sm:$0xff]  ;;  %v288_v44 = vld [vmem:[%s921_s4 + $0x80] sm:$0xff] }
  0x22   : > { %349 = vmatpush1.msra.mxu0 %v308_v24  ;;  %418 = vmatpush1.msra.mxu1 %v314_v31  ;;  %v299_v45 = vld [vmem:[%s921_s4 + $0xd8] sm:$0xff]  ;;  %v285_v46 = vld [vmem:[%s921_s4 + $0x68] sm:$0xff]  ;;  %v298_v47 = vld [vmem:[%s921_s4 + $0xd0] sm:$0xff] }
  0x23   : > { %350 = vmatprep.subr.mxu0 %v305_v26  ;;  %419 = vmatprep.subr.mxu1 %v311_v33  ;;  %v284_v48 = vld [vmem:[%s921_s4 + $0x60] sm:$0xff]  ;;  %v295_v49 = vld [vmem:[%s921_s4 + $0xb8] sm:$0xff]  ;;  %v281_v50 = vld [vmem:[%s921_s4 + $0x48] sm:$0xff] }
  0x24   : > { %351 = vmatpush1.msra.mxu0 %v304_v28  ;;  %420 = vmatpush1.msra.mxu1 %v310_v35  ;;  %v294_v51 = vld [vmem:[%s921_s4 + $0xb0] sm:$0xff]  ;;  %v280_v52 = vld [vmem:[%s921_s4 + $0x40] sm:$0xff]  ;;  %v277_v53 = vld [vmem:[%s921_s4 + $0x28] sm:$0xff] }
  0x25   : > { %352 = vmatprep.subr.mxu0 %v301_v30  ;;  %421 = vmatprep.subr.mxu1 %v307_v37  ;;  %v291_v54 = vld [vmem:[%s921_s4 + $0x98] sm:$0xff]  ;;  %v269_v55 = vld [vmem:[#allocation2] sm:$0xff]  ;;  %v290_v57 = vld [vmem:[%s921_s4 + $0x90] sm:$0xff] }
  0x26   : > { %353 = vmatpush1.msra.mxu0 %v300_v32  ;;  %422 = vmatpush1.msra.mxu1 %v306_v39  ;;  %v270_v56 = vld [vmem:[%s920_s3] sm:$0xff]  ;;  %v287_v59 = vld [vmem:[%s921_s4 + $0x78] sm:$0xff]  ;;  %v273_v60 = vld [vmem:[%s921_s4 + $0x8] sm:$0xff] }
  0x27   : > { %354 = vmatprep.subr.mxu0 %v297_v34  ;;  %423 = vmatprep.subr.mxu1 %v303_v41  ;;  %v276_v58 = vld [vmem:[%s921_s4 + $0x20] sm:$0xff]  ;;  %v286_v61 = vld [vmem:[%s921_s4 + $0x70] sm:$0xff]  ;;  %v271_v63 = vmul.f32 %v270_v56, %v269_v55  ;;  %v283_v0 = vld [vmem:[%s921_s4 + $0x58] sm:$0xff] }
  0x28   : > { %355 = vmatpush1.msra.mxu0 %v296_v36  ;;  %424 = vmatpush1.msra.mxu1 %v302_v43  ;;  %v272_v62 = vld [vmem:[%s921_s4] sm:$0xff]  ;;  %v282_v1 = vld [vmem:[%s921_s4 + $0x50] sm:$0xff]  ;;  %v279_v2 = vld [vmem:[%s921_s4 + $0x38] sm:$0xff] }
  0x29   : > { %356 = vmatprep.subr.mxu0 %v293_v38  ;;  %425 = vmatprep.subr.mxu1 %v299_v45  ;;  %v278_v3 = vld [vmem:[%s921_s4 + $0x30] sm:$0xff]  ;;  %v275_v4 = vld [vmem:[%s921_s4 + $0x18] sm:$0xff]  ;;  %v478_v6 = vld [vmem:[%s695_s28] sm:$0xff] }
  0x2a   : > { %357 = vmatpush1.msra.mxu0 %v292_v40  ;;  %426 = vmatpush1.msra.mxu1 %v298_v47  ;;  %v274_v5 = vld [vmem:[%s921_s4 + $0x10] sm:$0xff]  ;;  %v479_v8 = vld [vmem:[%s695_s28 + $0x8] sm:$0xff]  ;;  %v481_v16 = vld [vmem:[%s695_s28 + $0x18] sm:$0xff] }
  0x2b   : > { %358 = vmatprep.subr.mxu0 %v289_v42  ;;  %427 = vmatprep.subr.mxu1 %v295_v49  ;;  %v480_v17 = vld [vmem:[%s695_s28 + $0x10] sm:$0xff]  ;;  %v505_v28 = vld [vmem:[#allocation3] sm:$0xff] }
  0x2c   : > { %359 = vmatpush1.msra.mxu0 %v288_v44  ;;  %428 = vmatpush1.msra.mxu1 %v294_v51 }
  0x2d   : > { %360 = vmatprep.subr.mxu0 %v285_v46  ;;  %429 = vmatprep.subr.mxu1 %v291_v54 }
  0x2e   : > { %361 = vmatpush1.msra.mxu0 %v284_v48  ;;  %430 = vmatpush1.msra.mxu1 %v290_v57 }
  0x2f   : > { %362 = vmatprep.subr.mxu0 %v281_v50  ;;  %431 = vmatprep.subr.mxu1 %v287_v59 }
  0x30   : > { %363 = vmatpush1.msra.mxu0 %v280_v52  ;;  %432 = vmatpush1.msra.mxu1 %v286_v61 }
  0x31   : > { %364 = vmatprep.subr.mxu0 %v277_v53  ;;  %433 = vmatprep.subr.mxu1 %v283_v0 }
  0x32   : > { %365 = vmatpush1.msra.mxu0 %v276_v58  ;;  %434 = vmatpush1.msra.mxu1 %v282_v1 }
  0x33   : > { %366 = vmatprep.subr.mxu0 %v273_v60  ;;  %435 = vmatprep.subr.mxu1 %v279_v2 }
  0x34   : > { %367 = vmatpush1.msra.mxu0 %v272_v62  ;;  %436 = vmatpush1.msra.mxu1 %v278_v3 }
  0x35   : > { %401 = vmatmul.mubr.f32.vlgmr.msra.gmra.mxu0 %v271_v63  ;;  %437 = vmatprep.subr.mxu1 %v275_v4 }
  0x36   : > { %438 = vmatpush1.msra.mxu1 %v274_v5 }
  0x37   : > { %472 = vmatmul.mubr.f32.vlgmr.msra.gmra.mxu1 %v271_v63 }
  0xf5   : > { %v402_v7 = vpop.f32.mrf.mxu0 }
  0xf6   : > { %v482_v9 = vadd.f32 %v478_v6, %v402_v7 }
  0xf7   : > { %v404_v10 = vpop.f32.mrf.mxu0  ;;  %v473_v14 = vpop.f32.mrf.mxu1 }
  0xf8   : > { %v609_v11 = vmul.f32 -1.442695, %v482_v9  ;;  %v483_v12 = vadd.f32 %v479_v8, %v404_v10  ;;  %v484_v19 = vadd.f32 %v480_v17, %v473_v14 }
  0xf9   : > { %v475_v15 = vpop.f32.mrf.mxu1 }
  0xfa   : > { %624 = vpow2.f32 %v609_v11  ;;  %v610_v13 = vmul.f32 -1.442695, %v483_v12  ;;  %v485_v18 = vadd.f32 %v481_v16, %v475_v15 }
  0xfc   : > { %626 = vpow2.f32 %v610_v13  ;;  %v611_v20 = vmul.f32 -1.442695, %v485_v18 }
  0xfd   : > { %628 = vtanh.f32 %v484_v19 }
  0xfe   : > { %630 = vpow2.f32 %v611_v20 }
 0x107   : > { %v625_v21 = vpop.eup %624 }
 0x108   : > { %v489_v22 = vadd.f32 1.0, %v625_v21 }
 0x109   : > { %v627_v23 = vpop.eup %626 }
 0x10a   : > { %632 = vrcp.f32 %v489_v22  ;;  %v495_v24 = vadd.f32 1.0, %v627_v23  ;;  %v629_v25 = vpop.eup %628 }
 0x10b   : > { %v631_v26 = vpop.eup %630 }
 0x10c   : > { %634 = vrcp.f32 %v495_v24  ;;  %v502_v30 = vadd.f32 1.0, %v631_v26 }
 0x10e   : > { %636 = vrcp.f32 %v502_v30 }
 0x117   : > { %v633_v27 = vpop.eup %632 }
 0x118   : > { %v507_v32 = vmul.f32 %v633_v27, %v629_v25 }
 0x119   : > { %v635_v29 = vpop.eup %634 }
 0x11a   : > { %v506_v31 = vmul.f32 %v635_v29, %v505_v28 }
 0x11b   : > { %v637_v34 = vpop.eup %636 }
 0x11c   : > { %v508_v33 = vadd.f32 %v507_v32, %v506_v31 }
 0x11e   : > { %638 = vtanh.f32 %v508_v33  ;;  %512 = vst [vmem:[#allocation3] sm:$0xff] %v508_v33  ;;  %514 = vst [vmem:[%s705_s10] sm:$0xff] %v508_v33 }
 0x12b   : > { %v639_v35 = vpop.eup %638 }
 0x12c   : > { %v510_v36 = vmul.f32 %v639_v35, %v637_v34 }
 0x12e   : > { %511 = vst [vmem:[#allocation2] sm:$0xff] %v510_v36  ;;  %513 = vst [vmem:[%s700_s7] sm:$0xff] %v510_v36 }
 0x12f PF: > { %s17_s21 = sadd.s32 1, %s646_s21  }
 0x130   : > { %p14_p5 = scmp.ge.s32.totalorder %s17_s21, 8  }
 0x132   :  { %16 = sbr.rel (!%p14_p5) target bundleno = 1 (0x1), region = 86 }

</bundles_post_ra>
